<compile_context>
chip_gen: v7x
topology: tpu7x:2x2x1
jax: 0.10.0
libtpu: 0.0.40
codegen_flags: <defaults>
</compile_context>

<pallas_src>
import jax
import jax.numpy as jnp
from jax.experimental import pallas as pl
from jax.experimental.pallas import tpu as pltpu

LN_EPS = 1e-5  # nn.LayerNorm default


# ----------------------------- kernels ------------------------------------ #

def _fused_kernel(blk_ref, wt_ref, wb_ref, b_ref, o_ref):
    # blk_ref: (th, 2, Wp, 2C) contiguous slab of th merged row-pairs
    # wt_ref : (2C, Co) weight rows for even-h features [x0 | x2] (gamma folded)
    # wb_ref : (2C, Co) weight rows for odd-h  features [x1 | x3]
    # b_ref  : (1, Co)  beta @ W
    # o_ref  : (th*Wp, Co)
    th, _, wp, c2 = blk_ref.shape
    r = th * wp

    # Free leading-dim slices; reshape is a no-op relayout because Wp % 8 == 0
    # and the values are f32 at that point.
    top = blk_ref[:, 0].astype(jnp.float32).reshape(r, c2)
    bot = blk_ref[:, 1].astype(jnp.float32).reshape(r, c2)

    # One-pass LayerNorm statistics over the 4C merged features (fewer live
    # f32 temporaries than the two-pass / centered form).
    inv_n = 1.0 / (2.0 * c2)
    mean = (jnp.sum(top, axis=-1, keepdims=True)
            + jnp.sum(bot, axis=-1, keepdims=True)) * inv_n
    msq = (jnp.sum(top * top, axis=-1, keepdims=True)
           + jnp.sum(bot * bot, axis=-1, keepdims=True)) * inv_n
    var = jnp.maximum(msq - mean * mean, 0.0)
    rstd = jax.lax.rsqrt(var + LN_EPS)

    tn = ((top - mean) * rstd).astype(wt_ref.dtype)
    bn = ((bot - mean) * rstd).astype(wb_ref.dtype)
    acc = jnp.dot(tn, wt_ref[...], preferred_element_type=jnp.float32)
    acc = acc + jnp.dot(bn, wb_ref[...], preferred_element_type=jnp.float32)
    # TODO(synk): for Co < 128 the store is lane-masked; a lane-dense repack of
    # the output would need the downstream consumer to accept padded width.
    o_ref[...] = (acc + b_ref[...].astype(jnp.float32)).astype(o_ref.dtype)


def _rows_kernel(x_ref, w_ref, b_ref, o_ref):
    # Fallback: x_ref (tm, 4C) already-merged rows; w_ref (4C, Co); b_ref (1, Co)
    x = x_ref[...].astype(jnp.float32)
    inv_n = 1.0 / x.shape[-1]
    mean = jnp.sum(x, axis=-1, keepdims=True) * inv_n
    msq = jnp.sum(x * x, axis=-1, keepdims=True) * inv_n
    var = jnp.maximum(msq - mean * mean, 0.0)
    xn = ((x - mean) * jax.lax.rsqrt(var + LN_EPS)).astype(w_ref.dtype)
    acc = jnp.dot(xn, w_ref[...], preferred_element_type=jnp.float32)
    o_ref[...] = (acc + b_ref[...].astype(jnp.float32)).astype(o_ref.dtype)


# ----------------------------- wrapper ------------------------------------- #

def _vmem_capacity_bytes(default=64 * 1024 * 1024):
    """Physical VMEM bytes for this generation; conservative default (v7x)."""
    try:
        info = pltpu.get_tpu_info()
        for name in ("vmem_capacity_bytes", "vmem_bytes", "vmem_size_bytes"):
            v = getattr(info, name, None)
            if v:
                return int(v)
    except Exception:
        pass
    return default


def patch_merging_pallas(x, gamma, beta, w_red, input_resolution, *,
                         matmul_dtype=jnp.bfloat16, vmem_fraction=0.65):
    """Swin PatchMerging forward: x (B, H*W, C) -> (B, (H/2)*(W/2), 2C).

    w_red is (4C, 2C), i.e. the transpose of nn.Linear(4C, 2C).weight, so the
    math is LayerNorm(x_merged) @ w_red.  LN gamma/beta are folded into the
    weight/bias (exact in real arithmetic).  MXU operands default to bf16 with
    f32 statistics and f32 accumulation; pass matmul_dtype=jnp.float32 for an
    exact-f32 matmul.
    """
    H, W = input_resolution
    B, L, C = x.shape
    assert L == H * W, "input feature has wrong size"
    assert H % 2 == 0 and W % 2 == 0, f"x size ({H}*{W}) are not even."
    Hp, Wp = H // 2, W // 2
    C2, C4, Co = 2 * C, 4 * C, 2 * C
    Mp = B * Hp                      # merged row-pairs
    M = Mp * Wp                      # merged patches (output rows)

    matmul_dtype = jnp.dtype(matmul_dtype)
    f32 = jnp.float32
    w32 = w_red.astype(f32)                               # (4C, Co)
    w_aff = gamma.astype(f32).reshape(C4, 1) * w32        # fold LN gamma
    bias = (beta.astype(f32) @ w32).reshape(1, Co)        # fold LN beta

    in_b = x.dtype.itemsize
    out_dtype = x.dtype
    out_b = jnp.dtype(out_dtype).itemsize
    w_b = matmul_dtype.itemsize
    weight_bytes = C4 * Co * w_b + Co * 4

    cap = _vmem_capacity_bytes()
    tile_budget = max(2 * 1024 * 1024, int(cap * vmem_fraction) - weight_bytes)

    cost = pl.CostEstimate(
        flops=2 * M * C4 * Co,
        transcendentals=M,
        bytes_accessed=M * C4 * in_b + C4 * Co * w_b + M * Co * out_b)

    if Wp % 8 == 0:
        # ------------- fused path: gather done by the BlockSpec DMA ---------
        x4 = x.reshape(Mp, 2, Wp, C2)   # free view: (b*hp, h_parity, wp, [w_parity, c])
        # Kernel feature order per patch is [x0 | x2] (top) and [x1 | x3] (bot)
        # -> permute / split the (gamma-folded) weight rows once here.
        w_top = jnp.concatenate([w_aff[0:C], w_aff[2 * C:3 * C]], axis=0).astype(matmul_dtype)
        w_bot = jnp.concatenate([w_aff[C:2 * C], w_aff[3 * C:4 * C]], axis=0).astype(matmul_dtype)

        # Honest per-row-pair VMEM accounting (v7x has only 64 MiB):
        #   double-buffered input slab + double-buffered output tile
        #   + live f32 top/bot + cast tn/bn + f32 acc + per-row stats.
        rowpair_bytes = Wp * (2 * (2 * C2) * in_b          # input block  x2 (pipeline)
                              + 2 * Co * out_b             # output block x2 (pipeline)
                              + 2 * C2 * 4                 # top / bot (f32)
                              + 2 * C2 * w_b               # tn / bn
                              + Co * 4 + 32)               # acc (f32) + stats
        th = max(1, tile_budget // rowpair_bytes)
        th = min(th, Mp)
        if Mp >= 2:                       # >= 2 grid steps keeps both v7x TCs busy
            th = min(th, pl.cdiv(Mp, 2))
        grid = (pl.cdiv(Mp, th),)         # ragged last block is masked by Pallas

        vmem_need = th * rowpair_bytes + weight_bytes + 8 * 1024 * 1024
        vmem_limit = int(min(max(vmem_need, 32 * 1024 * 1024), cap * 17 // 20))

        out2d = pl.pallas_call(
            _fused_kernel,
            out_shape=jax.ShapeDtypeStruct((M, Co), out_dtype),
            grid_spec=pltpu.PrefetchScalarGridSpec(
                num_scalar_prefetch=0,
                grid=grid,
                in_specs=[
                    # One contiguous HBM slab per grid step (both h-parities).
                    pl.BlockSpec((th, 2, Wp, C2), lambda i: (i, 0, 0, 0)),
                    pl.BlockSpec(memory_space=pltpu.MemorySpace.VMEM),   # w_top
                    pl.BlockSpec(memory_space=pltpu.MemorySpace.VMEM),   # w_bot
                    pl.BlockSpec(memory_space=pltpu.MemorySpace.VMEM),   # bias
                ],
                out_specs=pl.BlockSpec((th * Wp, Co), lambda i: (i, 0)),
            ),
            compiler_params=pltpu.CompilerParams(
                dimension_semantics=("parallel",),
                vmem_limit_bytes=vmem_limit),
            cost_estimate=cost,
        )(x4, w_top, w_bot, bias)
        return out2d.reshape(B, Hp * Wp, Co)

    # ------------- fallback path (Wp not a multiple of 8) --------------------
    # TODO(synk): fuse the gather here too (needs an in-kernel sublane relayout
    # or a 3-D dot_general); for now one extra HBM pass materializes (M, 4C).
    x4 = x.reshape(Mp, 2, Wp, C2)
    xm = x4.transpose(0, 2, 1, 3).reshape(M, C4)   # feature order [x0 | x2 | x1 | x3]
    w_all = jnp.concatenate([w_aff[0:C], w_aff[2 * C:3 * C],
                             w_aff[C:2 * C], w_aff[3 * C:4 * C]],
                            axis=0).astype(matmul_dtype)

    row_bytes = (2 * C4 * in_b + 2 * Co * out_b       # pipelined in/out blocks
                 + C4 * 4 + C4 * w_b + Co * 4 + 32)   # x(f32) + xn + acc + stats
    tm = max(8, (tile_budget // row_bytes) // 8 * 8)
    if tm >= M:
        # whole problem fits: still split into ~2 blocks for megacore when possible
        tm = M if M < 16 else ((M + 15) // 16) * 8
    grid = (pl.cdiv(M, tm),)                          # ragged last block, no jnp.pad

    vmem_need = tm * row_bytes + C4 * Co * w_b + Co * 4 + 8 * 1024 * 1024
    vmem_limit = int(min(max(vmem_need, 32 * 1024 * 1024), cap * 17 // 20))

    out2d = pl.pallas_call(
        _rows_kernel,
        out_shape=jax.ShapeDtypeStruct((M, Co), out_dtype),
        grid_spec=pltpu.PrefetchScalarGridSpec(
            num_scalar_prefetch=0,
            grid=grid,
            in_specs=[
                pl.BlockSpec((tm, C4), lambda i: (i, 0)),
                pl.BlockSpec(memory_space=pltpu.MemorySpace.VMEM),       # weight
                pl.BlockSpec(memory_space=pltpu.MemorySpace.VMEM),       # bias
            ],
            out_specs=pl.BlockSpec((tm, Co), lambda i: (i, 0)),
        ),
        compiler_params=pltpu.CompilerParams(
            dimension_semantics=("parallel",),
            vmem_limit_bytes=vmem_limit),
        cost_estimate=cost,
    )(xm, w_all, bias)
    return out2d.reshape(B, Hp * Wp, Co)


# ----------------------------- reference ----------------------------------- #

def patch_merging_ref(x, gamma, beta, w_red, input_resolution):
    """Pure-JAX (f32) reference mirroring the PyTorch forward."""
    H, W = input_resolution
    B, L, C = x.shape
    xv = x.reshape(B, H, W, C)
    x0 = xv[:, 0::2, 0::2, :]
    x1 = xv[:, 1::2, 0::2, :]
    x2 = xv[:, 0::2, 1::2, :]
    x3 = xv[:, 1::2, 1::2, :]
    xm = jnp.concatenate([x0, x1, x2, x3], axis=-1).reshape(B, -1, 4 * C)
    xf = xm.astype(jnp.float32)
    mean = jnp.mean(xf, axis=-1, keepdims=True)
    var = jnp.mean((xf - mean) ** 2, axis=-1, keepdims=True)
    xn = (xf - mean) * jax.lax.rsqrt(var + LN_EPS)
    xn = xn * gamma.astype(jnp.float32) + beta.astype(jnp.float32)
    return xn @ w_red.astype(jnp.float32)


# ----------------------------- demo / test --------------------------------- #

if __name__ == "__main__":
    key = jax.random.PRNGKey(0)
    kx, kw, kg, kb, kx2 = jax.random.split(key, 5)

    # Case 1: fused path (W/2 multiple of 8), f32 activations.
    B, H, W, C = 2, 16, 16, 32
    x = jax.random.normal(kx, (B, H * W, C), dtype=jnp.float32)
    w_red = jax.random.normal(kw, (4 * C, 2 * C), dtype=jnp.float32) * 0.02
    gamma = 1.0 + 0.1 * jax.random.normal(kg, (4 * C,), dtype=jnp.float32)
    beta = 0.1 * jax.random.normal(kb, (4 * C,), dtype=jnp.float32)
    ref = patch_merging_ref(x, gamma, beta, w_red, (H, W))

    # 1a: default (bf16 MXU operands, f32 stats + accumulation).
    out = jax.block_until_ready(patch_merging_pallas(x, gamma, beta, w_red, (H, W)))
    assert out.shape == (B, (H // 2) * (W // 2), 2 * C)
    err = float(jnp.max(jnp.abs(out.astype(jnp.float32) - ref)))
    assert err < 3e-2, err

    # 1b: exact path with f32 MXU operands.
    out32 = jax.block_until_ready(
        patch_merging_pallas(x, gamma, beta, w_red, (H, W), matmul_dtype=jnp.float32))
    err32 = float(jnp.max(jnp.abs(out32.astype(jnp.float32) - ref)))
    assert err32 < 2e-4, err32

    # Case 2: bf16 activations (bf16 output), fused path.
    xb = x.astype(jnp.bfloat16)
    outb = jax.block_until_ready(patch_merging_pallas(xb, gamma, beta, w_red, (H, W)))
    refb = patch_merging_ref(xb.astype(jnp.float32), gamma, beta, w_red, (H, W))
    errb = float(jnp.max(jnp.abs(outb.astype(jnp.float32) - refb)))
    assert errb < 5e-2, errb

    # Case 3: fallback path (W/2 not a multiple of 8).
    B3, H3, W3, C3 = 2, 12, 12, 16
    x3 = jax.random.normal(kx2, (B3, H3 * W3, C3), dtype=jnp.float32)
    w3 = jax.random.normal(kw, (4 * C3, 2 * C3), dtype=jnp.float32) * 0.02
    g3 = 1.0 + 0.1 * jax.random.normal(kg, (4 * C3,), dtype=jnp.float32)
    b3 = 0.1 * jax.random.normal(kb, (4 * C3,), dtype=jnp.float32)
    ref3 = patch_merging_ref(x3, g3, b3, w3, (H3, W3))
    out3 = jax.block_until_ready(patch_merging_pallas(x3, g3, b3, w3, (H3, W3)))
    err3 = float(jnp.max(jnp.abs(out3.astype(jnp.float32) - ref3)))
    assert err3 < 3e-2, err3
    out3f = jax.block_until_ready(
        patch_merging_pallas(x3, g3, b3, w3, (H3, W3), matmul_dtype=jnp.float32))
    err3f = float(jnp.max(jnp.abs(out3f.astype(jnp.float32) - ref3)))
    assert err3f < 2e-4, err3f

    print("KERNEL_OK")
</pallas_src>

<mosaic_0001>
module attributes {stable_mosaic.version = 11 : i64} {
  func.func @_fused_kernel(%arg0: i32, %arg1: memref<8x2x8x64xf32, #tpu.memory_space<vmem>>, %arg2: memref<64x64xbf16, #tpu.memory_space<vmem>>, %arg3: memref<64x64xbf16, #tpu.memory_space<vmem>>, %arg4: memref<1x64xf32, #tpu.memory_space<vmem>>, %arg5: memref<64x64xf32, #tpu.memory_space<vmem>>) attributes {dimension_semantics = [#tpu.dimension_semantics<parallel>], iteration_bounds = array<i64: 2>, scalar_prefetch = 0 : i64, scratch_operands = 0 : i64, tpu.core_type = #tpu.core_type<tc>, window_params = [{transform_indices = @transform_0, window_bounds = array<i64: 8, 2, 8, 64>}, {pipeline_mode = #tpu.pipeline_mode<synchronous>, transform_indices = @transform_1, window_bounds = array<i64: 64, 64>}, {pipeline_mode = #tpu.pipeline_mode<synchronous>, transform_indices = @transform_2, window_bounds = array<i64: 64, 64>}, {pipeline_mode = #tpu.pipeline_mode<synchronous>, transform_indices = @transform_3, window_bounds = array<i64: 1, 64>}, {transform_indices = @transform_4, window_bounds = array<i64: 64, 64>}]} {
    %c0 = arith.constant 0 : index
    %c0_0 = arith.constant 0 : index
    %c0_1 = arith.constant 0 : index
    %c0_2 = arith.constant 0 : index
    %0 = vector.load %arg1[%c0, %c0_0, %c0_1, %c0_2] : memref<8x2x8x64xf32, #tpu.memory_space<vmem>>, vector<8x1x8x64xf32>
    %1 = vector.shape_cast %0 : vector<8x1x8x64xf32> to vector<8x8x64xf32>
    %2 = vector.shape_cast %1 : vector<8x8x64xf32> to vector<64x64xf32>
    %c0_3 = arith.constant 0 : index
    %c1 = arith.constant 1 : index
    %c0_4 = arith.constant 0 : index
    %c0_5 = arith.constant 0 : index
    %3 = vector.load %arg1[%c0_3, %c1, %c0_4, %c0_5] : memref<8x2x8x64xf32, #tpu.memory_space<vmem>>, vector<8x1x8x64xf32>
    %4 = vector.shape_cast %3 : vector<8x1x8x64xf32> to vector<8x8x64xf32>
    %5 = vector.shape_cast %4 : vector<8x8x64xf32> to vector<64x64xf32>
    %cst = arith.constant dense<0.000000e+00> : vector<64xf32>
    %6 = vector.multi_reduction <add>, %2, %cst [1] : vector<64x64xf32> to vector<64xf32>
    %7 = vector.shape_cast %6 : vector<64xf32> to vector<64x1xf32>
    %cst_6 = arith.constant dense<0.000000e+00> : vector<64xf32>
    %8 = vector.multi_reduction <add>, %5, %cst_6 [1] : vector<64x64xf32> to vector<64xf32>
    %9 = vector.shape_cast %8 : vector<64xf32> to vector<64x1xf32>
    %10 = arith.addf %7, %9 : vector<64x1xf32>
    %cst_7 = arith.constant 7.812500e-03 : f32
    %11 = vector.broadcast %cst_7 : f32 to vector<64x1xf32>
    %12 = arith.mulf %10, %11 : vector<64x1xf32>
    %13 = arith.mulf %2, %2 : vector<64x64xf32>
    %cst_8 = arith.constant dense<0.000000e+00> : vector<64xf32>
    %14 = vector.multi_reduction <add>, %13, %cst_8 [1] : vector<64x64xf32> to vector<64xf32>
    %15 = vector.shape_cast %14 : vector<64xf32> to vector<64x1xf32>
    %16 = arith.mulf %5, %5 : vector<64x64xf32>
    %cst_9 = arith.constant dense<0.000000e+00> : vector<64xf32>
    %17 = vector.multi_reduction <add>, %16, %cst_9 [1] : vector<64x64xf32> to vector<64xf32>
    %18 = vector.shape_cast %17 : vector<64xf32> to vector<64x1xf32>
    %19 = arith.addf %15, %18 : vector<64x1xf32>
    %cst_10 = arith.constant 7.812500e-03 : f32
    %20 = vector.broadcast %cst_10 : f32 to vector<64x1xf32>
    %21 = arith.mulf %19, %20 : vector<64x1xf32>
    %22 = arith.mulf %12, %12 : vector<64x1xf32>
    %23 = arith.subf %21, %22 : vector<64x1xf32>
    %cst_11 = arith.constant 0.000000e+00 : f32
    %24 = vector.broadcast %cst_11 : f32 to vector<64x1xf32>
    %25 = arith.maximumf %23, %24 : vector<64x1xf32>
    %cst_12 = arith.constant 9.99999974E-6 : f32
    %26 = vector.broadcast %cst_12 : f32 to vector<64x1xf32>
    %27 = arith.addf %25, %26 : vector<64x1xf32>
    %28 = math.rsqrt %27 : vector<64x1xf32>
    %29 = vector.broadcast %12 : vector<64x1xf32> to vector<64x64xf32>
    %30 = arith.subf %2, %29 : vector<64x64xf32>
    %31 = vector.broadcast %28 : vector<64x1xf32> to vector<64x64xf32>
    %32 = arith.mulf %30, %31 : vector<64x64xf32>
    %33 = arith.truncf %32 : vector<64x64xf32> to vector<64x64xbf16>
    %34 = vector.broadcast %12 : vector<64x1xf32> to vector<64x64xf32>
    %35 = arith.subf %5, %34 : vector<64x64xf32>
    %36 = vector.broadcast %28 : vector<64x1xf32> to vector<64x64xf32>
    %37 = arith.mulf %35, %36 : vector<64x64xf32>
    %38 = arith.truncf %37 : vector<64x64xf32> to vector<64x64xbf16>
    %c0_13 = arith.constant 0 : index
    %c0_14 = arith.constant 0 : index
    %39 = vector.load %arg2[%c0_13, %c0_14] : memref<64x64xbf16, #tpu.memory_space<vmem>>, vector<64x64xbf16>
    %cst_15 = arith.constant dense<0.000000e+00> : vector<64x64xf32>
    %40 = tpu.matmul %33, %39, %cst_15 {dimension_numbers = #tpu.dot_dimension_numbers<[1], [0], [0], [1], [0, 0, 1, 1], [], []>} : vector<64x64xbf16>, vector<64x64xbf16>, vector<64x64xf32> -> vector<64x64xf32>
    %c0_16 = arith.constant 0 : index
    %c0_17 = arith.constant 0 : index
    %41 = vector.load %arg3[%c0_16, %c0_17] : memref<64x64xbf16, #tpu.memory_space<vmem>>, vector<64x64xbf16>
    %cst_18 = arith.constant dense<0.000000e+00> : vector<64x64xf32>
    %42 = tpu.matmul %38, %41, %cst_18 {dimension_numbers = #tpu.dot_dimension_numbers<[1], [0], [0], [1], [0, 0, 1, 1], [], []>} : vector<64x64xbf16>, vector<64x64xbf16>, vector<64x64xf32> -> vector<64x64xf32>
    %43 = arith.addf %40, %42 : vector<64x64xf32>
    %c0_19 = arith.constant 0 : index
    %c0_20 = arith.constant 0 : index
    %44 = vector.load %arg4[%c0_19, %c0_20] : memref<1x64xf32, #tpu.memory_space<vmem>>, vector<1x64xf32>
    %45 = vector.broadcast %44 : vector<1x64xf32> to vector<64x64xf32>
    %46 = arith.addf %43, %45 : vector<64x64xf32>
    %c0_21 = arith.constant 0 : index
    %c0_22 = arith.constant 0 : index
    %47 = vector.load %arg5[%c0_21, %c0_22] : memref<64x64xf32, #tpu.memory_space<vmem>>, vector<64x64xf32>
    tpu.vector_store %arg5[%c0_21, %c0_22], %46 {strides = array<i32>} : memref<64x64xf32, #tpu.memory_space<vmem>>, vector<64x64xf32>,
    return
  }
  func.func @transform_0(%arg0: i32) -> (i32, i32, i32, i32) {
    %c0_i32 = arith.constant 0 : i32
    %c0_i32_0 = arith.constant 0 : i32
    %c0_i32_1 = arith.constant 0 : i32
    %c0_i32_2 = arith.constant 0 : i32
    return %arg0, %c0_i32, %c0_i32_0, %c0_i32_1 : i32, i32, i32, i32
  }
  func.func @transform_1(%arg0: i32) -> (i32, i32) {
    %c0_i32 = arith.constant 0 : i32
    %c0_i32_0 = arith.constant 0 : i32
    %c0_i32_1 = arith.constant 0 : i32
    return %c0_i32, %c0_i32_0 : i32, i32
  }
  func.func @transform_2(%arg0: i32) -> (i32, i32) {
    %c0_i32 = arith.constant 0 : i32
    %c0_i32_0 = arith.constant 0 : i32
    %c0_i32_1 = arith.constant 0 : i32
    return %c0_i32, %c0_i32_0 : i32, i32
  }
  func.func @transform_3(%arg0: i32) -> (i32, i32) {
    %c0_i32 = arith.constant 0 : i32
    %c0_i32_0 = arith.constant 0 : i32
    %c0_i32_1 = arith.constant 0 : i32
    return %c0_i32, %c0_i32_0 : i32, i32
  }
  func.func @transform_4(%arg0: i32) -> (i32, i32) {
    %c0_i32 = arith.constant 0 : i32
    %c0_i32_0 = arith.constant 0 : i32
    return %arg0, %c0_i32 : i32, i32
  }
}

</mosaic_0001>

<bundles_post_ra>
// kernel: tpu_custom_call.1
= control target key start
LH: loop header
LB: loop body
LE: loop exit
PB: predicated region body
PF: predicated region fallthrough
CT: control target
= control target key end

     0   :  { %9 = vsyncpa [#allocation3], 0  ;;  %s1520_s0 = inlined_call_operand.hbm [shape: f32[16,2,8,64], index: 0, kind: input, shape index: {}]   ;;  %s1521_s1 = inlined_call_operand.hbm [shape: bf16[64,64], index: 1, kind: input, shape index: {}]   ;;  %s1522_s2 = inlined_call_operand.hbm [shape: bf16[64,64], index: 2, kind: input, shape index: {}]   ;;  %s1523_s3 = inlined_call_operand.vmem [shape: f32[1,64], index: 3, kind: input, shape index: {}]   ;;  %s1524_s4 = inlined_call_operand.vmem [shape: f32[128,64], index: 4, kind: output, shape index: {}]  }
   0x1   :  { %11 = vsyncpa [#allocation3 + $0x1], 0 }
   0x2   :  { %12 = vsyncpa [#allocation5], 0  ;;  %s1167_s15 = smov 0   ;;  %s1169_s16 = smov 0  }
   0x3   :  { %s1171_s17 = smov 0   ;;  %s1173_s18 = smov 0  }
   0x4 LB: > { %s820_s19 = sadd.s32 4294967295, %s1133_s18   ;;  %p38_p0 = scmp.ne.s32.totalorder %s1125_s16, %s1121_s15  ;;  %s1133_s18 = sphi %s1173_s18, %s1540_s18   ;;  %s1129_s17 = sphi %s1171_s17, %s1539_s17   ;;  %s1125_s16 = sphi %s1169_s16, %s1538_s16   ;;  %s1121_s15 = sphi %s1167_s15, %s1537_s15  }
   0x5   : > { %p1189_p1 = scmp.eq.s32.totalorder %s820_s19, 0  ;;  %p822_p2 = scmp.ge.s32.totalorder %s1133_s18, 1 }
   0x6   : > { %p138_p3 = scmp.lt.s32.totalorder %s1133_s18, 3  ;;  %s1135_s23 = smov [#allocation4]  }
   0x7   : > { %s1529_s20 = scalar_select %p1189_p1, 1, 0 }
   0x8   : > { %p1197_p4 = por %p1189_p1, %p38_p0  ;;  %p1201_p5 = pnand %p822_p2, %p138_p3 }
   0x9   : > { %s150_s24 = sshll.u32 %s1135_s23, 4  ;;  %s1136_s26 = smov [#allocation6]   ;;  %s151_s24 = int_to_ptr.vmem [resolvable:$true] %s150_s24 }
   0xa   : > { %s1530_s21 = scalar_select %p1197_p4, 1, 0 }
   0xb   : > { %s1531_s22 = scalar_select %p1201_p5, 1, 0 }
   0xc   : > { %p931_p6 = pneg %p1201_p5  ;;  %s163_s27 = sshll.u32 %s1136_s26, 4  ;;  %s1213_s27 = int_to_ptr.vmem [resolvable:$true] %s163_s27 }
   0xd   : > { %s1009_s30 = scalar_lea.hbm %s1521_s1, 512 }
   0xe   : > { %p1209_p7 = pnand %p931_p6, %p1189_p1  ;;  %p1010_p8 = scmp.ne.s32.totalorder %s1521_s1, %s1009_s30 }
   0xf   : > { %p1016_p12 = scmp.lt.u32.totalorder %s1009_s30, %s1521_s1 }
  0x10   : > { %p1011_p9 = pneg %p1209_p7 }
  0x12   : > { %p1012_p10 = pnand %p1011_p9, %p1010_p8 }
  0x14   : > { %p1013_p11 = pneg %p1012_p10 }
  0x16   : > { %p1018_p13 = pnand %p1016_p12, %p1013_p11 }
  0x18   : > { %1021 = shalt.err (!%p1018_p13)
}
  0x19   : > { %s1022_s9 = scalar_lea.vmem %s151_s24, 512  ;;  %p1030_p6 = scmp.lt.s32.totalorder %s151_s24, %s151_s24 }
  0x1a   : > { %p1023_p0 = scmp.ne.s32.totalorder %s151_s24, %s1022_s9  ;;  %p1031_p1 = scmp.lt.s32.totalorder %s1022_s9, %s1022_s9 }
  0x1c   : > { %p1025_p2 = pnand %p1023_p0, %p1011_p9  ;;  %p1032_p4 = por %p1031_p1, %p1030_p6 }
  0x1e   : > { %p1026_p3 = pneg %p1025_p2 }
  0x20   : > { %p1033_p5 = pnand %p1032_p4, %p1026_p3 }
  0x22   : > { %1036 = shalt.err (!%p1033_p5)
}
  0x23   : > { %s1137_s10 = smov 64   ;;  %s1138_s11 = smov 4  }
  0x24   : > { %934 = dma.hbm_to_vmem [thread:$0]  (!%p1209_p7), %s1521_s1, 512, %s151_s24, [#allocation5], %s1137_s10, %s1137_s10, %s1138_s11  }
  0x25   : > { %s1037_s23 = scalar_lea.hbm %s1522_s2, 512 }
  0x26   : > { %p1038_p8 = scmp.ne.s32.totalorder %s1522_s2, %s1037_s23  ;;  %p1044_p5 = scmp.lt.u32.totalorder %s1037_s23, %s1522_s2 }
  0x28   : > { %p1040_p1 = pnand %p1038_p8, %p1011_p9 }
  0x2a   : > { %p1041_p4 = pneg %p1040_p1 }
  0x2c   : > { %p1046_p10 = pnand %p1044_p5, %p1041_p4 }
  0x2e   : > { %1049 = shalt.err (!%p1046_p10)
}
  0x2f   : > { %s1050_s24 = scalar_lea.vmem %s1213_s27, 512  ;;  %p1058_p0 = scmp.lt.s32.totalorder %s1213_s27, %s1213_s27 }
  0x30   : > { %p1051_p11 = scmp.ne.s32.totalorder %s1213_s27, %s1050_s24  ;;  %p1059_p2 = scmp.lt.s32.totalorder %s1050_s24, %s1050_s24 }
  0x32   : > { %p1053_p12 = pnand %p1051_p11, %p1011_p9  ;;  %p1060_p3 = por %p1059_p2, %p1058_p0 }
  0x34   : > { %p1054_p13 = pneg %p1053_p12 }
  0x36   : > { %p1061_p6 = pnand %p1060_p3, %p1054_p13 }
  0x38   : > { %1064 = shalt.err (!%p1061_p6)
}
  0x39   : > { %937 = dma.hbm_to_vmem [thread:$0]  (!%p1209_p7), %s1522_s2, 512, %s1213_s27, [#allocation5], %s1137_s10, %s1137_s10, %s1138_s11  }
  0x3a   : > { %s1263_s7 = sadd.s32 1, %s1133_s18   ;;  %s25_s8 = sadd.s32 1, %s1129_s17 }
  0x3b   : > { %s22_s25 = ssub.s32 %s1133_s18, %s1263_s7  ;;  %p32_p9 = scmp.ne.s32.totalorder %s1129_s17, %s1125_s16 }
  0x3c   : > { %p23_p8 = scmp.eq.s32.totalorder %s22_s25, 0  ;;  %p33_p1 = scmp.eq.s32.totalorder %s1133_s18, 0 }
  0x3d   : > { %p944_p4 = scmp.lt.s32.totalorder %s1133_s18, 2  ;;  %s180_s9 = sand.u32 1, %s1129_s17  }
  0x3e   : > { %s1274_s12 = scalar_select %p23_p8, %s1129_s17, %s25_s8  }
  0x3f   : > { %p34_p5 = por %p33_p1, %p32_p9  ;;  %s826_s13 = sshll.u32 %s180_s9, 7 }
  0x40   : > { %s864_s14 = sshll.u32 %s1133_s18, 11  ;;  %s184_s27 = scalar_lea.vmem [#allocation2], %s826_s13 }
  0x41   : > { %s1280_s26 = scalar_lea.hbm %s1520_s0, %s864_s14  ;;  %s192_s10 = sshll.u32 %s184_s27, 4  ;;  %s1286_s10 = int_to_ptr.vmem [resolvable:$true] %s192_s10 }
  0x42   : > { %p1282_p7 = pnand %p944_p4, %p34_p5  ;;  %s1288_s28 = scalar_lea.sflag [#allocation3], %s180_s9 }
  0x43   : > { %s1065_s29 = scalar_lea.hbm %s1280_s26, 2048  ;;  %s1070_s5 = scalar_lea.hbm %s1520_s0, 4096 }
  0x44   : > { %p1066_p10 = scmp.ne.s32.totalorder %s1280_s26, %s1065_s29  ;;  %p1067_p11 = pneg %p1282_p7 }
  0x45   : > { %p1071_p0 = scmp.lt.u32.totalorder %s1280_s26, %s1520_s0  ;;  %p1072_p2 = scmp.lt.u32.totalorder %s1070_s5, %s1065_s29 }
  0x46   : > { %p1068_p12 = pnand %p1067_p11, %p1066_p10  ;;  %p1074_p6 = scmp.lt.u32.totalorder %s1065_s29, %s1280_s26 }
  0x47   : > { %p1073_p3 = por %p1072_p2, %p1071_p0 }
  0x48   : > { %p1069_p13 = pneg %p1068_p12 }
  0x49   : > { %p1075_p9 = por %p1074_p6, %p1073_p3 }
  0x4b   : > { %p1076_p8 = pnand %p1075_p9, %p1069_p13 }
  0x4d   : > { %1079 = shalt.err (!%p1076_p8)
}
  0x4e   : > { %s1080_s25 = scalar_lea.vmem %s1286_s10, 2048  ;;  %s1139_s9 = smov [#allocation2]  }
  0x4f   : > { %p1081_p1 = scmp.ne.s32.totalorder %s1286_s10, %s1080_s25  ;;  %s1085_s13 = sshll.u32 %s1139_s9, 4  ;;  %s1086_s13 = int_to_ptr.vmem [resolvable:$false] %s1085_s13 }
  0x50   : > { %s1087_s14 = scalar_lea.vmem %s1086_s13, 4096  ;;  %p1088_p10 = scmp.lt.s32.totalorder %s1286_s10, %s1086_s13 }
  0x51   : > { %p1083_p4 = pnand %p1081_p1, %p1067_p11  ;;  %p1089_p12 = scmp.lt.s32.totalorder %s1087_s14, %s1080_s25 }
  0x53   : > { %p1084_p5 = pneg %p1083_p4  ;;  %p1090_p0 = por %p1089_p12, %p1088_p10 }
  0x55   : > { %p1091_p2 = pnand %p1090_p0, %p1084_p5 }
  0x57   : > { %1094 = shalt.err (!%p1091_p2)
}
  0x58   : > { %s1140_s15 = smov 128   ;;  %s1141_s23 = smov 8  }
  0x59   : > { %941 = dma.hbm_to_vmem [thread:$0]  (!%p1282_p7), %s1280_s26, 2048, %s1286_s10, %s1288_s28, %s1140_s15, %s1140_s15, %s1141_s23  }
  0x5a   : > { %p1534_p11 = scmp.ne.s32.totalorder %s1531_s22, 0 }
  0x5b   : > { %s206_s27 = sand.u32 (!%p1534_p11), 1, %s1125_s16   ;;  %p1535_p13 = scmp.ne.s32.totalorder (!%p1534_p11), %s1530_s21, 0 }
  0x5c   : > { %204 = sbr.rel (%p1534_p11) target bundleno = 553 (0x229), region = 36  ;;  %s831_s29 = sshll.u32 (!%p1534_p11), %s206_s27, 7 }
  0x5d   : > { %s207_s30 = scalar_lea.sflag (!%p1534_p11), [#allocation3], %s206_s27  ;;  %s1319_s24 = scalar_lea.vmem (!%p1534_p11), [#allocation2], %s831_s29 }
  0x63   : > { %1112 = dma.done.wait (%p1535_p13), %s207_s30, 2048  }
  0x64   : > { %1114 = vsyncadd (%p1535_p13), %s207_s30, 4294965248  ;;  %p1536_p3 = scmp.ne.s32.totalorder %s1529_s20, 0 }
  0x66   : > { %1116 = dma.done.wait (%p1536_p3), [#allocation5], 1024  }
  0x67   : > { %1118 = vsyncadd (%p1536_p3), [#allocation5], 4294966272  ;;  %vm268_vm0 = vcmask 523264   ;;  %v1330_v0 = vld [vmem:[%s1319_s24 + $0x8] sm:$0xff]  ;;  %v1333_v1 = vld [vmem:[%s1319_s24] sm:$0xff]  ;;  %s834_s20 = sshll.u32 %s820_s19, 3 }
  0x68   : > { %v1336_v2 = vld [vmem:[%s1319_s24 + $0x18] sm:$0xff]  ;;  %v293_v3 = vsel %vm268_vm0, %v1330_v0, 0.0  ;;  %v269_v4 = vsel %vm268_vm0, %v1333_v1, 0.0  ;;  %v1343_v5 = vld [vmem:[%s1319_s24 + $0x10] sm:$0xff]  ;;  %v1353_v9 = vld [vmem:[%s1319_s24 + $0x20] sm:$0xff]  ;;  %v333_v17 = vmul.f32 %v1333_v1, %v1333_v1  ;;  %v365_v21 = vmul.f32 %v1330_v0, %v1330_v0  ;;  %p245_p7 = scmp.lt.s32.totalorder %s834_s20, 15 }
  0x69   : > { %294 = vadd.xlane.f32.xlu1 %v293_v3  ;;  %270 = vadd.xlane.f32.xlu0 %v269_v4  ;;  %v296_v6 = vsel %vm268_vm0, %v1336_v2, 0.0  ;;  %v272_v7 = vsel %vm268_vm0, %v1343_v5, 0.0  ;;  %v1350_v8 = vld [vmem:[%s1319_s24 + $0x30] sm:$0xff]  ;;  %v275_v11 = vsel %vm268_vm0, %v1353_v9, 0.0  ;;  %v1360_v12 = vld [vmem:[%s1319_s24 + $0x38] sm:$0xff]  ;;  %v1363_v13 = vld [vmem:[%s1319_s24 + $0x28] sm:$0xff]  ;;  %v334_v16 = vmul.f32 %v1343_v5, %v1343_v5 }
  0x6a   : > { %v278_v10 = vsel %vm268_vm0, %v1350_v8, 0.0  ;;  %v302_v14 = vsel %vm268_vm0, %v1360_v12, 0.0  ;;  %v299_v15 = vsel %vm268_vm0, %v1363_v13, 0.0  ;;  %v341_v19 = vsel %vm268_vm0, %v333_v17, 0.0  ;;  %v1394_v32 = vld [vmem:[%s1319_s24 + $0x50] sm:$0xff]  ;;  %v1397_v33 = vld [vmem:[%s1319_s24 + $0x40] sm:$0xff] }
  0x6b   : > { %v344_v18 = vsel %vm268_vm0, %v334_v16, 0.0  ;;  %v366_v20 = vmul.f32 %v1336_v2, %v1336_v2  ;;  %v373_v23 = vsel %vm268_vm0, %v365_v21, 0.0  ;;  %v336_v24 = vmul.f32 %v1350_v8, %v1350_v8  ;;  %v1404_v36 = vld [vmem:[%s1319_s24 + $0x58] sm:$0xff]  ;;  %v1407_v37 = vld [vmem:[%s1319_s24 + $0x48] sm:$0xff]  ;;  %v1414_v40 = vld [vmem:[%s1319_s24 + $0x70] sm:$0xff]  ;;  %s1542_s20 = smov (!%p245_p7, %s834_s20), 15 }
  0x6c   : > { %v335_v25 = vmul.f32 %v1353_v9, %v1353_v9  ;;  %v368_v28 = vmul.f32 %v1360_v12, %v1360_v12  ;;  %v367_v29 = vmul.f32 %v1363_v13, %v1363_v13  ;;  %v284_v34 = vsel %vm268_vm0, %v1394_v32, 0.0  ;;  %v1417_v41 = vld [vmem:[%s1319_s24 + $0x60] sm:$0xff]  ;;  %v1424_v44 = vld [vmem:[%s1319_s24 + $0x78] sm:$0xff]  ;;  %v1427_v45 = vld [vmem:[%s1319_s24 + $0x68] sm:$0xff]  ;;  %s835_s21 = sshll.u32 %s1542_s20, 3 }
  0x6d   : > { %297 = vadd.xlane.f32.xlu1 %v296_v6  ;;  %273 = vadd.xlane.f32.xlu0 %v272_v7  ;;  %v376_v22 = vsel %vm268_vm0, %v366_v20, 0.0  ;;  %v350_v26 = vsel %vm268_vm0, %v336_v24, 0.0  ;;  %v281_v35 = vsel %vm268_vm0, %v1397_v33, 0.0  ;;  %v308_v38 = vsel %vm268_vm0, %v1404_v36, 0.0  ;;  %v985_v58 = vld [vmem:[#allocation6] sm:$0xff]   ;;  %v987_v3 = vld [vmem:[#allocation6 + $0x8] sm:$0xff]   ;;  %s1489_s28 = scalar_lea.vmem %s1524_s4, %s835_s21 }
  0x6e   : > { %v347_v27 = vsel %vm268_vm0, %v335_v25, 0.0  ;;  %v382_v30 = vsel %vm268_vm0, %v368_v28, 0.0  ;;  %v379_v31 = vsel %vm268_vm0, %v367_v29, 0.0  ;;  %v305_v39 = vsel %vm268_vm0, %v1407_v37, 0.0  ;;  %v986_v59 = vld [vmem:[#allocation4] sm:$0xff]   ;;  %881 = vmatprep.subr.bf16.mxu1 %v985_v58  ;;  %v988_v4 = vld [vmem:[#allocation4 + $0x8] sm:$0xff]  }
  0x6f   : > { %v290_v42 = vsel %vm268_vm0, %v1414_v40, 0.0  ;;  %v287_v43 = vsel %vm268_vm0, %v1417_v41, 0.0  ;;  %v314_v46 = vsel %vm268_vm0, %v1424_v44, 0.0  ;;  %v311_v47 = vsel %vm268_vm0, %v1427_v45, 0.0  ;;  %897 = vmatprep.subr.bf16.mxu0 %v986_v59  ;;  %882 = vmatpush3.bf16.msra.mxu1 %v985_v58 }
  0x70   : > { %v338_v48 = vmul.f32 %v1394_v32, %v1394_v32  ;;  %v337_v49 = vmul.f32 %v1397_v33, %v1397_v33  ;;  %v370_v52 = vmul.f32 %v1404_v36, %v1404_v36  ;;  %v369_v53 = vmul.f32 %v1407_v37, %v1407_v37  ;;  %898 = vmatpush3.bf16.msra.mxu0 %v986_v59 }
  0x71   : > { %279 = vadd.xlane.f32.xlu1 %v278_v10  ;;  %276 = vadd.xlane.f32.xlu0 %v275_v11  ;;  %v340_v56 = vmul.f32 %v1414_v40, %v1414_v40  ;;  %v339_v57 = vmul.f32 %v1417_v41, %v1417_v41  ;;  %v372_v62 = vmul.f32 %v1424_v44, %v1424_v44  ;;  %v989_v10 = vld [vmem:[#allocation6 + $0x10] sm:$0xff]  }
  0x72   : > { %v356_v50 = vsel %vm268_vm0, %v338_v48, 0.0  ;;  %v353_v51 = vsel %vm268_vm0, %v337_v49, 0.0  ;;  %v388_v54 = vsel %vm268_vm0, %v370_v52, 0.0  ;;  %v385_v55 = vsel %vm268_vm0, %v369_v53, 0.0  ;;  %883 = vmatprep.subr.bf16.mxu1 %v987_v3  ;;  %899 = vmatprep.subr.bf16.mxu0 %v988_v4  ;;  %v990_v11 = vld [vmem:[#allocation4 + $0x10] sm:$0xff]  }
  0x73   : > { %v362_v60 = vsel %vm268_vm0, %v340_v56, 0.0  ;;  %v359_v61 = vsel %vm268_vm0, %v339_v57, 0.0  ;;  %v371_v63 = vmul.f32 %v1427_v45, %v1427_v45  ;;  %v394_v6 = vsel %vm268_vm0, %v372_v62, 0.0  ;;  %884 = vmatpush3.bf16.msra.mxu1 %v987_v3 }
  0x74   : > { %900 = vmatpush3.bf16.msra.mxu0 %v988_v4  ;;  %885 = vmatprep.subr.bf16.mxu1 %v989_v10 }
  0x75   : > { %303 = vadd.xlane.f32.xlu1 %v302_v14  ;;  %300 = vadd.xlane.f32.xlu0 %v299_v15  ;;  %v391_v7 = vsel %vm268_vm0, %v371_v63, 0.0  ;;  %v991_v14 = vld [vmem:[#allocation6 + $0x18] sm:$0xff]  }
  0x76   : > { %901 = vmatprep.subr.bf16.mxu0 %v990_v11  ;;  %v992_v15 = vld [vmem:[#allocation4 + $0x18] sm:$0xff]  }
  0x77   : > { %886 = vmatpush3.bf16.msra.mxu1 %v989_v10 }
  0x78   : > { %902 = vmatpush3.bf16.msra.mxu0 %v990_v11  ;;  %887 = vmatprep.subr.bf16.mxu1 %v991_v14 }
  0x79   : > { %345 = vadd.xlane.f32.xlu1 %v344_v18  ;;  %342 = vadd.xlane.f32.xlu0 %v341_v19 }
  0x7a   : > { %903 = vmatprep.subr.bf16.mxu0 %v992_v15 }
  0x7b   : > { %888 = vmatpush3.bf16.msra.mxu1 %v991_v14 }
  0x7c   : > { %904 = vmatpush3.bf16.msra.mxu0 %v992_v15 }
  0x7d   : > { %377 = vadd.xlane.f32.xlu1 %v376_v22  ;;  %374 = vadd.xlane.f32.xlu0 %v373_v23 }
  0x81   : > { %351 = vadd.xlane.f32.xlu1 %v350_v26  ;;  %348 = vadd.xlane.f32.xlu0 %v347_v27 }
  0x85   : > { %383 = vadd.xlane.f32.xlu1 %v382_v30  ;;  %380 = vadd.xlane.f32.xlu0 %v379_v31 }
  0x89   : > { %285 = vadd.xlane.f32.xlu1 %v284_v34  ;;  %282 = vadd.xlane.f32.xlu0 %v281_v35 }
  0x8d   : > { %309 = vadd.xlane.f32.xlu1 %v308_v38  ;;  %306 = vadd.xlane.f32.xlu0 %v305_v39 }
  0x91   : > { %291 = vadd.xlane.f32.xlu1 %v290_v42  ;;  %288 = vadd.xlane.f32.xlu0 %v287_v43 }
  0x95   : > { %315 = vadd.xlane.f32.xlu1 %v314_v46  ;;  %312 = vadd.xlane.f32.xlu0 %v311_v47 }
  0x99   : > { %357 = vadd.xlane.f32.xlu1 %v356_v50  ;;  %354 = vadd.xlane.f32.xlu0 %v353_v51 }
  0x9d   : > { %389 = vadd.xlane.f32.xlu1 %v388_v54  ;;  %386 = vadd.xlane.f32.xlu0 %v385_v55 }
  0xa1   : > { %363 = vadd.xlane.f32.xlu1 %v362_v60  ;;  %360 = vadd.xlane.f32.xlu0 %v359_v61 }
  0xa5   : > { %395 = vadd.xlane.f32.xlu1 %v394_v6  ;;  %392 = vadd.xlane.f32.xlu0 %v391_v7 }
  0xf6   : > { %v295_v16 = vpop.xlane.xlu1 %294  ;;  %v271_v17 = vpop.xlane.xlu0 %270 }
  0xf7   : > { %v317_v24 = vadd.f32 %v295_v16, %v271_v17 }
  0xf9   : > { %v325_v28 = vmul.f32 0.0078125, %v317_v24 }
  0xfa   : > { %v298_v18 = vpop.xlane.xlu1 %297  ;;  %v274_v19 = vpop.xlane.xlu0 %273 }
  0xfb   : > { %v318_v25 = vadd.f32 %v298_v18, %v274_v19  ;;  %v413_v39 = vmul.f32 %v325_v28, %v325_v28 }
  0xfd   : > { %v326_v29 = vmul.f32 0.0078125, %v318_v25  ;;  %v473_v25 = vsub.f32 %v1330_v0, %v325_v28 }
  0xfe   : > { %v280_v20 = vpop.xlane.xlu1 %279  ;;  %v277_v21 = vpop.xlane.xlu0 %276 }
  0xff   : > { %v414_v46 = vmul.f32 %v326_v29, %v326_v29 }
 0x102   : > { %v304_v22 = vpop.xlane.xlu1 %303  ;;  %v301_v23 = vpop.xlane.xlu0 %300 }
 0x103   : > { %v320_v38 = vadd.f32 %v304_v22, %v280_v20  ;;  %v319_v42 = vadd.f32 %v301_v23, %v277_v21  ;;  %v474_v22 = vsub.f32 %v1336_v2, %v326_v29  ;;  %v454_v23 = vsub.f32 %v1343_v5, %v326_v29 }
 0x105   : > { %v328_v52 = vmul.f32 0.0078125, %v320_v38  ;;  %v327_v53 = vmul.f32 0.0078125, %v319_v42 }
 0x106   : > { %v346_v26 = vpop.xlane.xlu1 %345  ;;  %v343_v27 = vpop.xlane.xlu0 %342 }
 0x107   : > { %v416_v62 = vmul.f32 %v328_v52, %v328_v52  ;;  %v415_v3 = vmul.f32 %v327_v53, %v327_v53  ;;  %v456_v2 = vsub.f32 %v1350_v8, %v328_v52  ;;  %v476_v0 = vsub.f32 %v1360_v12, %v328_v52 }
 0x108   : > { %v455_v29 = vsub.f32 %v1353_v9, %v327_v53 }
 0x10a   : > { %v378_v30 = vpop.xlane.xlu1 %377  ;;  %v375_v31 = vpop.xlane.xlu0 %374 }
 0x10b   : > { %v398_v34 = vadd.f32 %v378_v30, %v346_v26  ;;  %v397_v35 = vadd.f32 %v375_v31, %v343_v27  ;;  %v453_v26 = vsub.f32 %v1333_v1, %v325_v28 }
 0x10d   : > { %v406_v43 = vmul.f32 0.0078125, %v398_v34  ;;  %v405_v47 = vmul.f32 0.0078125, %v397_v35 }
 0x10e   : > { %v352_v48 = vpop.xlane.xlu1 %351  ;;  %v349_v49 = vpop.xlane.xlu0 %348 }
 0x10f   : > { %v422_v50 = vsub.f32 %v406_v43, %v414_v46  ;;  %v421_v51 = vsub.f32 %v405_v47, %v413_v39 }
 0x111   : > { %v430_v54 = vmax.f32 %v422_v50, 0.0  ;;  %v429_v55 = vmax.f32 %v421_v51, 0.0 }
 0x112   : > { %v384_v56 = vpop.xlane.xlu1 %383  ;;  %v381_v57 = vpop.xlane.xlu0 %380 }
 0x113   : > { %v438_v58 = vadd.f32 1e-05, %v430_v54  ;;  %v437_v59 = vadd.f32 1e-05, %v429_v55  ;;  %v400_v60 = vadd.f32 %v384_v56, %v352_v48  ;;  %v399_v61 = vadd.f32 %v381_v57, %v349_v49 }
 0x114   : > { %v475_v48 = vsub.f32 %v1363_v13, %v327_v53 }
 0x115   : > { %993 = vrsqrt.f32 %v438_v58  ;;  %v408_v63 = vmul.f32 0.0078125, %v400_v60  ;;  %v407_v4 = vmul.f32 0.0078125, %v399_v61 }
 0x116   : > { %995 = vrsqrt.f32 %v437_v59  ;;  %v286_v6 = vpop.xlane.xlu1 %285  ;;  %v283_v7 = vpop.xlane.xlu0 %282 }
 0x117   : > { %v424_v10 = vsub.f32 %v408_v63, %v416_v62  ;;  %v423_v11 = vsub.f32 %v407_v4, %v415_v3 }
 0x119   : > { %v432_v14 = vmax.f32 %v424_v10, 0.0  ;;  %v431_v15 = vmax.f32 %v423_v11, 0.0 }
 0x11a   : > { %v310_v16 = vpop.xlane.xlu1 %309  ;;  %v307_v17 = vpop.xlane.xlu0 %306 }
 0x11b   : > { %v440_v18 = vadd.f32 1e-05, %v432_v14  ;;  %v439_v19 = vadd.f32 1e-05, %v431_v15  ;;  %v322_v46 = vadd.f32 %v310_v16, %v286_v6  ;;  %v321_v47 = vadd.f32 %v307_v17, %v283_v7 }
 0x11d   : > { %997 = vrsqrt.f32 %v440_v18  ;;  %v330_v50 = vmul.f32 0.0078125, %v322_v46  ;;  %v329_v55 = vmul.f32 0.0078125, %v321_v47 }
 0x11e   : > { %999 = vrsqrt.f32 %v439_v19  ;;  %v292_v20 = vpop.xlane.xlu1 %291  ;;  %v289_v21 = vpop.xlane.xlu0 %288 }
 0x11f   : > { %v994_v24 = vpop.eup %993  ;;  %v418_v62 = vmul.f32 %v330_v50, %v330_v50  ;;  %v417_v9 = vmul.f32 %v329_v55, %v329_v55  ;;  %v477_v46 = vsub.f32 %v1407_v37, %v329_v55 }
 0x120   : > { %v996_v27 = vpop.eup %995  ;;  %v482_v30 = vmul.f32 %v994_v24, %v474_v22  ;;  %v462_v31 = vmul.f32 %v994_v24, %v454_v23 }
 0x121   : > { %v481_v34 = vmul.f32 %v996_v27, %v473_v25  ;;  %v461_v35 = vmul.f32 %v996_v27, %v453_v26 }
 0x122   : > { %v316_v38 = vpop.xlane.xlu1 %315  ;;  %v313_v39 = vpop.xlane.xlu0 %312 }
 0x123   : > { %v489_v42 = vpack.c.bf16 %v482_v30, %v481_v34  ;;  %v469_v43 = vpack.c.bf16 %v462_v31, %v461_v35  ;;  %v324_v52 = vadd.f32 %v316_v38, %v292_v20  ;;  %v323_v63 = vadd.f32 %v313_v39, %v289_v21 }
 0x124   : > { %v458_v38 = vsub.f32 %v1394_v32, %v330_v50  ;;  %v478_v39 = vsub.f32 %v1404_v36, %v330_v50 }
 0x125   : > { %889 = vmatprep.mubr.msk.bf16.mxu1 %vm268_vm0, %v489_v42  ;;  %905 = vmatprep.mubr.msk.bf16.mxu0 %vm268_vm0, %v469_v43  ;;  %v332_v10 = vmul.f32 0.0078125, %v324_v52  ;;  %v331_v11 = vmul.f32 0.0078125, %v323_v63  ;;  %v457_v43 = vsub.f32 %v1397_v33, %v329_v55 }
 0x126   : > { %v358_v1 = vpop.xlane.xlu1 %357  ;;  %v355_v5 = vpop.xlane.xlu0 %354 }
 0x127   : > { %v998_v28 = vpop.eup %997  ;;  %v420_v22 = vmul.f32 %v332_v10, %v332_v10  ;;  %v419_v24 = vmul.f32 %v331_v11, %v331_v11  ;;  %v460_v32 = vsub.f32 %v1414_v40, %v332_v10  ;;  %v480_v36 = vsub.f32 %v1424_v44, %v332_v10  ;;  %v860_v44 = vld [vmem:[%s1523_s3] ss:$0 sm:$0xff] }
 0x128   : > { %v1000_v49 = vpop.eup %999  ;;  %v484_v51 = vmul.f32 %v998_v28, %v476_v0  ;;  %v464_v54 = vmul.f32 %v998_v28, %v456_v2  ;;  %v459_v33 = vsub.f32 %v1417_v41, %v331_v11  ;;  %v479_v37 = vsub.f32 %v1427_v45, %v331_v11 }
 0x129   : > { %v483_v56 = vmul.f32 %v1000_v49, %v475_v48  ;;  %v463_v57 = vmul.f32 %v1000_v49, %v455_v29 }
 0x12a   : > { %v390_v58 = vpop.xlane.xlu1 %389  ;;  %v387_v59 = vpop.xlane.xlu0 %386 }
 0x12b   : > { %v402_v60 = vadd.f32 %v390_v58, %v358_v1  ;;  %v401_v8 = vadd.f32 %v387_v59, %v355_v5  ;;  %v490_v61 = vpack.c.bf16 %v484_v51, %v483_v56  ;;  %v470_v12 = vpack.c.bf16 %v464_v54, %v463_v57 }
 0x12d   : > { %v410_v3 = vmul.f32 0.0078125, %v402_v60  ;;  %v409_v4 = vmul.f32 0.0078125, %v401_v8  ;;  %890 = vmatmul.mubr.msk.bf16.vlgmr.msra.gmra.mrb[0].mxu1 %vm268_vm0, %v490_v61  ;;  %906 = vmatmul.mubr.msk.bf16.vlgmr.msra.gmra.mrb[0].mxu0 %vm268_vm0, %v470_v12 }
 0x12e   : > { %v364_v13 = vpop.xlane.xlu1 %363  ;;  %v361_v53 = vpop.xlane.xlu0 %360 }
 0x12f   : > { %v426_v6 = vsub.f32 %v410_v3, %v418_v62  ;;  %v425_v7 = vsub.f32 %v409_v4, %v417_v9 }
 0x131   : > { %v434_v14 = vmax.f32 %v426_v6, 0.0  ;;  %v433_v15 = vmax.f32 %v425_v7, 0.0 }
 0x132   : > { %v396_v16 = vpop.xlane.xlu1 %395  ;;  %v393_v17 = vpop.xlane.xlu0 %392 }
 0x133   : > { %v442_v18 = vadd.f32 1e-05, %v434_v14  ;;  %v441_v19 = vadd.f32 1e-05, %v433_v15  ;;  %v404_v20 = vadd.f32 %v396_v16, %v364_v13  ;;  %v403_v21 = vadd.f32 %v393_v17, %v361_v53 }
 0x135   : > { %1001 = vrsqrt.f32 %v442_v18  ;;  %v412_v23 = vmul.f32 0.0078125, %v404_v20  ;;  %v411_v25 = vmul.f32 0.0078125, %v403_v21 }
 0x136   : > { %1003 = vrsqrt.f32 %v441_v19 }
 0x137   : > { %v428_v26 = vsub.f32 %v412_v23, %v420_v22  ;;  %v427_v27 = vsub.f32 %v411_v25, %v419_v24 }
 0x139   : > { %v436_v30 = vmax.f32 %v428_v26, 0.0  ;;  %v435_v31 = vmax.f32 %v427_v27, 0.0 }
 0x13b   : > { %v444_v34 = vadd.f32 1e-05, %v436_v30  ;;  %v443_v35 = vadd.f32 1e-05, %v435_v31 }
 0x13d   : > { %1005 = vrsqrt.f32 %v444_v34 }
 0x13e   : > { %1007 = vrsqrt.f32 %v443_v35 }
 0x13f   : > { %v1002_v42 = vpop.eup %1001 }
 0x140   : > { %v1004_v47 = vpop.eup %1003  ;;  %v486_v2 = vmul.f32 %v1002_v42, %v478_v39  ;;  %v466_v0 = vmul.f32 %v1002_v42, %v458_v38 }
 0x141   : > { %v485_v1 = vmul.f32 %v1004_v47, %v477_v46  ;;  %v465_v5 = vmul.f32 %v1004_v47, %v457_v43 }
 0x143   : > { %v491_v28 = vpack.c.bf16 %v486_v2, %v485_v1  ;;  %v471_v29 = vpack.c.bf16 %v466_v0, %v465_v5 }
 0x145   : > { %893 = vmatprep.mubr.msk.bf16.mxu1 %vm268_vm0, %v491_v28  ;;  %909 = vmatprep.mubr.msk.bf16.mxu0 %vm268_vm0, %v471_v29 }
 0x147   : > { %v1006_v48 = vpop.eup %1005 }
 0x148   : > { %v1008_v49 = vpop.eup %1007  ;;  %v488_v50 = vmul.f32 %v1006_v48, %v480_v36  ;;  %v468_v51 = vmul.f32 %v1006_v48, %v460_v32 }
 0x149   : > { %v487_v54 = vmul.f32 %v1008_v49, %v479_v37  ;;  %v467_v55 = vmul.f32 %v1008_v49, %v459_v33 }
 0x14b   : > { %v492_v56 = vpack.c.bf16 %v488_v50, %v487_v54  ;;  %v472_v57 = vpack.c.bf16 %v468_v51, %v467_v55 }
 0x14d   : > { %894 = vmatmul.mubr.msk.bf16.gmra.mrb[4].mxu1 %vm268_vm0, %v492_v56  ;;  %910 = vmatmul.mubr.msk.bf16.gmra.mrb[4].mxu0 %vm268_vm0, %v472_v57 }
 0x200   : > { %v891_v40 = vpop.f32.mrb[0].mxu1  ;;  %v907_v41 = vpop.f32.mrb[0].mxu0 }
 0x201   : > { %v689_v45 = vadd.f32 %v907_v41, %v891_v40  ;;  %v579_v58 = vpop.f32.mrb[1].mxu1  ;;  %v680_v59 = vpop.f32.mrb[1].mxu0 }
 0x202   : > { %v681_v60 = vadd.f32 %v680_v59, %v579_v58  ;;  %v892_v8 = vpop.f32.mrb[2].mxu1  ;;  %v908_v61 = vpop.f32.mrb[2].mxu0 }
 0x203   : > { %v720_v12 = vadd.f32 %v860_v44, %v689_v45  ;;  %v692_v52 = vadd.f32 %v908_v61, %v892_v8  ;;  %v582_v62 = vpop.f32.mrb[3].mxu1  ;;  %v683_v63 = vpop.f32.mrb[3].mxu0 }
 0x204   : > { %v718_v3 = vadd.f32 %v860_v44, %v681_v60  ;;  %v684_v9 = vadd.f32 %v683_v63, %v582_v62 }
 0x205   : > { %728 = vst.msk [vmem:[%s1489_s28 + $0x10] sm:$0xff] %vm268_vm0, %v720_v12  ;;  %v721_v4 = vadd.f32 %v860_v44, %v692_v52 }
 0x206   : > { %726 = vst.msk [vmem:[%s1489_s28] sm:$0xff] %vm268_vm0, %v718_v3  ;;  %v719_v13 = vadd.f32 %v860_v44, %v684_v9 }
 0x207   : > { %729 = vst.msk [vmem:[%s1489_s28 + $0x18] sm:$0xff] %vm268_vm0, %v721_v4 }
 0x208   : > { %727 = vst.msk [vmem:[%s1489_s28 + $0x8] sm:$0xff] %vm268_vm0, %v719_v13 }
 0x220   : > { %v895_v53 = vpop.f32.mrb[4].mxu1  ;;  %v911_v6 = vpop.f32.mrb[4].mxu0 }
 0x221   : > { %v705_v7 = vadd.f32 %v911_v6, %v895_v53  ;;  %v595_v10 = vpop.f32.mrb[5].mxu1  ;;  %v696_v11 = vpop.f32.mrb[5].mxu0 }
 0x222   : > { %v697_v14 = vadd.f32 %v696_v11, %v595_v10  ;;  %v896_v15 = vpop.f32.mrb[6].mxu1  ;;  %v912_v16 = vpop.f32.mrb[6].mxu0 }
 0x223   : > { %v724_v17 = vadd.f32 %v860_v44, %v705_v7  ;;  %v708_v18 = vadd.f32 %v912_v16, %v896_v15  ;;  %v598_v19 = vpop.f32.mrb[7].mxu1  ;;  %v699_v20 = vpop.f32.mrb[7].mxu0 }
 0x224   : > { %v722_v21 = vadd.f32 %v860_v44, %v697_v14  ;;  %v700_v22 = vadd.f32 %v699_v20, %v598_v19 }
 0x225   : > { %732 = vst.msk [vmem:[%s1489_s28 + $0x30] sm:$0xff] %vm268_vm0, %v724_v17  ;;  %v725_v23 = vadd.f32 %v860_v44, %v708_v18 }
 0x226   : > { %730 = vst.msk [vmem:[%s1489_s28 + $0x20] sm:$0xff] %vm268_vm0, %v722_v21  ;;  %v723_v24 = vadd.f32 %v860_v44, %v700_v22 }
 0x227   : > { %733 = vst.msk [vmem:[%s1489_s28 + $0x38] sm:$0xff] %vm268_vm0, %v725_v23 }
 0x228   : > { %731 = vst.msk [vmem:[%s1489_s28 + $0x28] sm:$0xff] %vm268_vm0, %v723_v24 }
 0x229 PF: > { %p15_p6 = scmp.ge.s32.totalorder %s1263_s7, 4   ;;  %s1537_s15 = smov %s1125_s16 }
 0x22a   : > { %s1538_s16 = smov %s1129_s17  ;;  %s1539_s17 = smov %s1274_s12 }
 0x22b   : > { %s1540_s18 = smov %s1263_s7  ;;  %17 = sbr.rel (!%p15_p6) target bundleno = 4 (0x4), region = 85 }
 0x232   :  { %756 = vsyncpa [#allocation3], 1 }
 0x233   :  { %758 = vsyncpa [#allocation3 + $0x1], 1 }
 0x234   :  { %759 = vsyncpa [#allocation5], 1 }

</bundles_post_ra>
